<compile_context>
chip_gen: v7x
topology: tpu7x:2x2x1
jax: 0.10.0
libtpu: 0.0.40
codegen_flags: <defaults>
</compile_context>

<pallas_src>
import functools

import jax
import jax.numpy as jnp
from jax.experimental import pallas as pl
from jax.experimental.pallas import tpu as pltpu

_SUBLANE = 8
_MAX_BATCH_TILE = 2048   # rows; per-tile working set at real widths is << VMEM


def _round_up(x, m):
    return ((x + m - 1) // m) * m


def _num_tensorcores():
    """TensorCores per device: v7x has 2, v5e/v6e have 1.

    The grid is a sequential loop on one TC, so splitting the batch into >=2
    tiles only pays off when dimension_semantics=("parallel",) can shard the
    grid across cores (v7x).  Unknown device kinds default to 1 (no split).
    """
    kind = jax.devices()[0].device_kind.lower()
    return 2 if "v7" in kind else 1


def _pick_batch_tile(b_padded, num_tc):
    bt = min(_MAX_BATCH_TILE, b_padded)
    if num_tc > 1 and b_padded >= num_tc * _SUBLANE:
        # Equal-sized tiles with n_tiles a multiple of num_tc so both
        # TensorCores get a full, equal share of grid steps.
        n_tiles = _round_up(pl.cdiv(b_padded, bt), num_tc)
        bt = pl.cdiv(b_padded, n_tiles)
    return max(_SUBLANE, _round_up(bt, _SUBLANE))


def critic_kernel(obs_ref, w1_ref, b1_ref, w2_ref, b2_ref, w3_ref, b3_ref,
                  out_ref, *, compute_dtype):
    """Fused obs -> Linear+ReLU -> Linear+ReLU -> Linear for one batch tile.

    All matmuls accumulate in f32; biases are added in f32.  compute_dtype
    selects the matmul operand dtype: f32 (default, matches the PyTorch
    module's numerics) or bf16 (faster, MXU-native, slightly lower precision).
    Any cast happens here, not in the wrapper.
    """
    x = obs_ref[...].astype(compute_dtype)
    h = jnp.dot(x, w1_ref[...].astype(compute_dtype),
                preferred_element_type=jnp.float32)
    h = jnp.maximum(h + b1_ref[...], 0.0)
    h = jnp.dot(h.astype(compute_dtype), w2_ref[...].astype(compute_dtype),
                preferred_element_type=jnp.float32)
    h = jnp.maximum(h + b2_ref[...], 0.0)
    out = jnp.dot(h.astype(compute_dtype), w3_ref[...].astype(compute_dtype),
                  preferred_element_type=jnp.float32)
    out_ref[...] = (out + b3_ref[...]).astype(out_ref.dtype)


def _as_row(b):
    b = jnp.asarray(b, jnp.float32)
    return b.reshape(1, -1) if b.ndim == 1 else b


def critic_forward(obs, params, *, batch_tile=None, compute_dtype=jnp.float32):
    """obs: [B, obs_dim] f32.  params: w1,b1,w2,b2,w3,b3, weights laid out [in, out]
    (y = x @ W + b, identical math to torch's x @ W.T + b).  Biases may be 1-D
    or (1, out)."""
    obs = jnp.asarray(obs, jnp.float32)
    B, obs_dim = obs.shape
    w1 = jnp.asarray(params["w1"], jnp.float32)
    w2 = jnp.asarray(params["w2"], jnp.float32)
    w3 = jnp.asarray(params["w3"], jnp.float32)
    b1, b2, b3 = _as_row(params["b1"]), _as_row(params["b2"]), _as_row(params["b3"])
    h1, h2, act_dim = w1.shape[1], w2.shape[1], w3.shape[1]

    # Pad only the batch, and only to the sublane multiple (8).  Feature dims
    # stay at their real widths: full-extent last dims are exempt from the
    # 128-lane rule and Mosaic handles the internal layout.
    B_p = _round_up(B, _SUBLANE)
    if B_p != B:
        obs = jnp.pad(obs, ((0, B_p - B), (0, 0)))

    num_tc = _num_tensorcores()
    if batch_tile is None:
        batch_tile = _pick_batch_tile(B_p, num_tc)
    batch_tile = max(_SUBLANE, _round_up(batch_tile, _SUBLANE))
    n_tiles = pl.cdiv(B_p, batch_tile)   # partial edge block handled by Pallas

    def full(shape):
        # Whole-array block, constant index map -> fetched once, stays resident.
        return pl.BlockSpec(shape, lambda i: (0,) * len(shape))

    out_padded = pl.pallas_call(
        functools.partial(critic_kernel, compute_dtype=compute_dtype),
        out_shape=jax.ShapeDtypeStruct((B_p, act_dim), jnp.float32),
        grid_spec=pltpu.PrefetchScalarGridSpec(
            num_scalar_prefetch=0,
            grid=(n_tiles,),
            in_specs=[
                pl.BlockSpec((batch_tile, obs_dim), lambda i: (i, 0)),  # obs tile
                full((obs_dim, h1)), full((1, h1)),
                full((h1, h2)),      full((1, h2)),
                full((h2, act_dim)), full((1, act_dim)),
            ],
            out_specs=pl.BlockSpec((batch_tile, act_dim), lambda i: (i, 0)),
        ),
        compiler_params=pltpu.CompilerParams(
            dimension_semantics=("parallel",),
        ),
    )(obs, w1, b1, w2, b2, w3, b3)

    return out_padded if B_p == B else out_padded[:B]


def init_critic_params(key, obs_dim, hidden_sizes, act_dim):
    """Deterministic PyTorch-nn.Linear-style init: uniform(-1/sqrt(fan_in), +).

    Weights stored as [in_features, out_features]; biases 1-D (like torch).
    """
    sizes = [obs_dim] + list(hidden_sizes) + [act_dim]
    params = {}
    for j in range(len(sizes) - 1):
        fan_in, fan_out = sizes[j], sizes[j + 1]
        key, kw, kb = jax.random.split(key, 3)
        bound = 1.0 / (fan_in ** 0.5)
        params[f"w{j + 1}"] = jax.random.uniform(
            kw, (fan_in, fan_out), jnp.float32, -bound, bound)
        params[f"b{j + 1}"] = jax.random.uniform(
            kb, (fan_out,), jnp.float32, -bound, bound)
    return params


def critic_reference(obs, params):
    """Pure-JAX f32 reference matching the PyTorch Critic forward."""
    hp = jax.lax.Precision.HIGHEST
    h = jnp.maximum(
        jnp.dot(obs, params["w1"], precision=hp) + params["b1"].reshape(1, -1), 0.0)
    h = jnp.maximum(
        jnp.dot(h, params["w2"], precision=hp) + params["b2"].reshape(1, -1), 0.0)
    return jnp.dot(h, params["w3"], precision=hp) + params["b3"].reshape(1, -1)


if __name__ == "__main__":
    # Small shapes consistent with Critic(obs_dim, act_dim, hidden_sizes, nn.ReLU)
    batch = 16
    obs_dim = 16
    hidden_sizes = (32, 32)
    act_dim = 8

    key = jax.random.PRNGKey(0)
    key, k_obs = jax.random.split(key)
    obs = jax.random.normal(k_obs, (batch, obs_dim), jnp.float32)
    params = init_critic_params(key, obs_dim, hidden_sizes, act_dim)

    out = critic_forward(obs, params)
    out = jax.block_until_ready(out)

    ref = critic_reference(obs, params)
    assert out.shape == (batch, act_dim)
    assert jnp.allclose(out, ref, atol=1e-2, rtol=1e-2), "mismatch vs reference"

    print("KERNEL_OK")
</pallas_src>

<mosaic_0001>
module attributes {stable_mosaic.version = 11 : i64} {
  func.func @critic_kernel(%arg0: i32, %arg1: memref<16x16xf32, #tpu.memory_space<vmem>>, %arg2: memref<16x32xf32, #tpu.memory_space<vmem>>, %arg3: memref<1x32xf32, #tpu.memory_space<vmem>>, %arg4: memref<32x32xf32, #tpu.memory_space<vmem>>, %arg5: memref<1x32xf32, #tpu.memory_space<vmem>>, %arg6: memref<32x8xf32, #tpu.memory_space<vmem>>, %arg7: memref<1x8xf32, #tpu.memory_space<vmem>>, %arg8: memref<16x8xf32, #tpu.memory_space<vmem>>) attributes {dimension_semantics = [#tpu.dimension_semantics<parallel>], iteration_bounds = array<i64: 1>, scalar_prefetch = 0 : i64, scratch_operands = 0 : i64, tpu.core_type = #tpu.core_type<tc>, window_params = [{transform_indices = @transform_0, window_bounds = array<i64: 16, 16>}, {pipeline_mode = #tpu.pipeline_mode<synchronous>, transform_indices = @transform_1, window_bounds = array<i64: 16, 32>}, {pipeline_mode = #tpu.pipeline_mode<synchronous>, transform_indices = @transform_2, window_bounds = array<i64: 1, 32>}, {pipeline_mode = #tpu.pipeline_mode<synchronous>, transform_indices = @transform_3, window_bounds = array<i64: 32, 32>}, {pipeline_mode = #tpu.pipeline_mode<synchronous>, transform_indices = @transform_4, window_bounds = array<i64: 1, 32>}, {pipeline_mode = #tpu.pipeline_mode<synchronous>, transform_indices = @transform_5, window_bounds = array<i64: 32, 8>}, {pipeline_mode = #tpu.pipeline_mode<synchronous>, transform_indices = @transform_6, window_bounds = array<i64: 1, 8>}, {transform_indices = @transform_7, window_bounds = array<i64: 16, 8>}]} {
    %c0 = arith.constant 0 : index
    %c0_0 = arith.constant 0 : index
    %0 = vector.load %arg1[%c0, %c0_0] : memref<16x16xf32, #tpu.memory_space<vmem>>, vector<16x16xf32>
    %c0_1 = arith.constant 0 : index
    %c0_2 = arith.constant 0 : index
    %1 = vector.load %arg2[%c0_1, %c0_2] : memref<16x32xf32, #tpu.memory_space<vmem>>, vector<16x32xf32>
    %cst = arith.constant dense<0.000000e+00> : vector<16x32xf32>
    %2 = tpu.matmul %0, %1, %cst {dimension_numbers = #tpu.dot_dimension_numbers<[1], [0], [0], [1], [0, 0, 1, 1], [], []>} : vector<16x16xf32>, vector<16x32xf32>, vector<16x32xf32> -> vector<16x32xf32>
    %c0_3 = arith.constant 0 : index
    %c0_4 = arith.constant 0 : index
    %3 = vector.load %arg3[%c0_3, %c0_4] : memref<1x32xf32, #tpu.memory_space<vmem>>, vector<1x32xf32>
    %4 = vector.broadcast %3 : vector<1x32xf32> to vector<16x32xf32>
    %5 = arith.addf %2, %4 : vector<16x32xf32>
    %cst_5 = arith.constant 0.000000e+00 : f32
    %6 = vector.broadcast %cst_5 : f32 to vector<16x32xf32>
    %7 = arith.maximumf %5, %6 : vector<16x32xf32>
    %c0_6 = arith.constant 0 : index
    %c0_7 = arith.constant 0 : index
    %8 = vector.load %arg4[%c0_6, %c0_7] : memref<32x32xf32, #tpu.memory_space<vmem>>, vector<32x32xf32>
    %cst_8 = arith.constant dense<0.000000e+00> : vector<16x32xf32>
    %9 = tpu.matmul %7, %8, %cst_8 {dimension_numbers = #tpu.dot_dimension_numbers<[1], [0], [0], [1], [0, 0, 1, 1], [], []>} : vector<16x32xf32>, vector<32x32xf32>, vector<16x32xf32> -> vector<16x32xf32>
    %c0_9 = arith.constant 0 : index
    %c0_10 = arith.constant 0 : index
    %10 = vector.load %arg5[%c0_9, %c0_10] : memref<1x32xf32, #tpu.memory_space<vmem>>, vector<1x32xf32>
    %11 = vector.broadcast %10 : vector<1x32xf32> to vector<16x32xf32>
    %12 = arith.addf %9, %11 : vector<16x32xf32>
    %cst_11 = arith.constant 0.000000e+00 : f32
    %13 = vector.broadcast %cst_11 : f32 to vector<16x32xf32>
    %14 = arith.maximumf %12, %13 : vector<16x32xf32>
    %c0_12 = arith.constant 0 : index
    %c0_13 = arith.constant 0 : index
    %15 = vector.load %arg6[%c0_12, %c0_13] : memref<32x8xf32, #tpu.memory_space<vmem>>, vector<32x8xf32>
    %cst_14 = arith.constant dense<0.000000e+00> : vector<16x8xf32>
    %16 = tpu.matmul %14, %15, %cst_14 {dimension_numbers = #tpu.dot_dimension_numbers<[1], [0], [0], [1], [0, 0, 1, 1], [], []>} : vector<16x32xf32>, vector<32x8xf32>, vector<16x8xf32> -> vector<16x8xf32>
    %c0_15 = arith.constant 0 : index
    %c0_16 = arith.constant 0 : index
    %17 = vector.load %arg7[%c0_15, %c0_16] : memref<1x8xf32, #tpu.memory_space<vmem>>, vector<1x8xf32>
    %18 = vector.broadcast %17 : vector<1x8xf32> to vector<16x8xf32>
    %19 = arith.addf %16, %18 : vector<16x8xf32>
    %c0_17 = arith.constant 0 : index
    %c0_18 = arith.constant 0 : index
    %20 = vector.load %arg8[%c0_17, %c0_18] : memref<16x8xf32, #tpu.memory_space<vmem>>, vector<16x8xf32>
    tpu.vector_store %arg8[%c0_17, %c0_18], %19 {strides = array<i32>} : memref<16x8xf32, #tpu.memory_space<vmem>>, vector<16x8xf32>,
    return
  }
  func.func @transform_0(%arg0: i32) -> (i32, i32) {
    %c0_i32 = arith.constant 0 : i32
    %c0_i32_0 = arith.constant 0 : i32
    return %arg0, %c0_i32 : i32, i32
  }
  func.func @transform_1(%arg0: i32) -> (i32, i32) {
    %c0_i32 = arith.constant 0 : i32
    %c0_i32_0 = arith.constant 0 : i32
    %c0_i32_1 = arith.constant 0 : i32
    return %c0_i32, %c0_i32_0 : i32, i32
  }
  func.func @transform_2(%arg0: i32) -> (i32, i32) {
    %c0_i32 = arith.constant 0 : i32
    %c0_i32_0 = arith.constant 0 : i32
    %c0_i32_1 = arith.constant 0 : i32
    return %c0_i32, %c0_i32_0 : i32, i32
  }
  func.func @transform_3(%arg0: i32) -> (i32, i32) {
    %c0_i32 = arith.constant 0 : i32
    %c0_i32_0 = arith.constant 0 : i32
    %c0_i32_1 = arith.constant 0 : i32
    return %c0_i32, %c0_i32_0 : i32, i32
  }
  func.func @transform_4(%arg0: i32) -> (i32, i32) {
    %c0_i32 = arith.constant 0 : i32
    %c0_i32_0 = arith.constant 0 : i32
    %c0_i32_1 = arith.constant 0 : i32
    return %c0_i32, %c0_i32_0 : i32, i32
  }
  func.func @transform_5(%arg0: i32) -> (i32, i32) {
    %c0_i32 = arith.constant 0 : i32
    %c0_i32_0 = arith.constant 0 : i32
    %c0_i32_1 = arith.constant 0 : i32
    return %c0_i32, %c0_i32_0 : i32, i32
  }
  func.func @transform_6(%arg0: i32) -> (i32, i32) {
    %c0_i32 = arith.constant 0 : i32
    %c0_i32_0 = arith.constant 0 : i32
    %c0_i32_1 = arith.constant 0 : i32
    return %c0_i32, %c0_i32_0 : i32, i32
  }
  func.func @transform_7(%arg0: i32) -> (i32, i32) {
    %c0_i32 = arith.constant 0 : i32
    %c0_i32_0 = arith.constant 0 : i32
    return %arg0, %c0_i32 : i32, i32
  }
}

</mosaic_0001>

<bundles_post_ra>
// kernel: tpu_custom_call.1
= control target key start
LH: loop header
LB: loop body
LE: loop exit
PB: predicated region body
PF: predicated region fallthrough
CT: control target
= control target key end

     0   :  { %12 = vsyncpa [#allocation3], 0  ;;  %s431_s24 = smov [#allocation2]   ;;  %s535_s0 = inlined_call_operand.vmem [shape: f32[16,16], index: 0, kind: input, shape index: {}]   ;;  %s536_s1 = inlined_call_operand.hbm [shape: f32[16,32], index: 1, kind: input, shape index: {}]   ;;  %s537_s2 = inlined_call_operand.vmem [shape: f32[1,32], index: 2, kind: input, shape index: {}]   ;;  %s538_s3 = inlined_call_operand.vmem [shape: f32[32,32], index: 3, kind: input, shape index: {}]   ;;  %s539_s4 = inlined_call_operand.vmem [shape: f32[1,32], index: 4, kind: input, shape index: {}]   ;;  %s540_s5 = inlined_call_operand.vmem [shape: f32[32,8], index: 5, kind: input, shape index: {}]   ;;  %s541_s6 = inlined_call_operand.vmem [shape: f32[1,8], index: 6, kind: input, shape index: {}]   ;;  %s542_s7 = inlined_call_operand.vmem [shape: f32[16,8], index: 7, kind: output, shape index: {}]  }
   0x1   :  { %s20_s25 = sshll.u32 %s431_s24, 4  ;;  %s407_s28 = scalar_lea.hbm %s536_s1, 256  ;;  %s21_s25 = int_to_ptr.vmem [resolvable:$true] %s20_s25 }
   0x2   :  { %p408_p0 = scmp.ne.s32.totalorder %s536_s1, %s407_s28  ;;  %p411_p1 = scmp.lt.u32.totalorder %s407_s28, %s536_s1 }
   0x4   :  { %p413_p2 = pnand %p411_p1, %p408_p0 }
   0x6   :  { %416 = shalt.err (!%p413_p2)
}
   0x7   :  { %s417_s10 = scalar_lea.vmem %s21_s25, 256  ;;  %p422_p4 = scmp.lt.s32.totalorder %s21_s25, %s21_s25 }
   0x8   :  { %p418_p3 = scmp.ne.s32.totalorder %s21_s25, %s417_s10  ;;  %p423_p5 = scmp.lt.s32.totalorder %s417_s10, %s417_s10 }
   0xa   :  { %p424_p6 = por %p423_p5, %p422_p4 }
   0xc   :  { %p425_p7 = pnand %p424_p6, %p418_p3 }
   0xe   :  { %428 = shalt.err (!%p425_p7)
}
   0xf   :  { %s432_s11 = smov 128   ;;  %s433_s12 = smov 8  }
  0x10   :  { %26 = dma.hbm_to_vmem [thread:$0]  %s536_s1, 256, %s21_s25, [#allocation3], %s432_s11, %s432_s11, %s433_s12  }
  0x11   :  { %429 = dma.done.wait [#allocation3], 256  }
  0x12   :  { %430 = vsyncadd [#allocation3], 4294967040  ;;  %vm51_vm0 = vcmask 130048   ;;  %v42_v0 = vld [vmem:[#allocation2] sm:$0xff]  ;;  %v43_v1 = vld [vmem:[#allocation2 + $0x8] sm:$0xff]  ;;  %vm146_vm1 = vcmask 261120  }
  0x13   :  { %v40_v2 = vld [vmem:[%s535_s0] sm:$0xff]  ;;  %v384_v3 = vpack.c.bf16 %v43_v1, %v42_v0  ;;  %v136_v5 = vld [vmem:[%s538_s3 + $0x8] sm:$0xff]  ;;  %v137_v8 = vld [vmem:[%s538_s3 + $0x10] sm:$0xff]  ;;  %vm322_vm2 = vcmask 64512  }
  0x14   :  { %359 = vmatprep.mubr.msk.f32.mxu0 %vm51_vm0, %v40_v2  ;;  %v135_v4 = vld [vmem:[%s538_s3] sm:$0xff]  ;;  %v41_v7 = vld [vmem:[%s535_s0 + $0x8] sm:$0xff]  ;;  %v138_v9 = vld [vmem:[%s538_s3 + $0x18] sm:$0xff] }
  0x15   :  { %v388_v6 = vpack.c.bf16 %v136_v5, %v135_v4  ;;  %385 = vmatprep.subr.bf16.mxu0 %v384_v3  ;;  %v392_v10 = vpack.c.bf16 %v138_v9, %v137_v8  ;;  %v230_v11 = vld [vmem:[%s540_s5] sm:$0xff]  ;;  %v231_v12 = vld [vmem:[%s540_s5 + $0x8] sm:$0xff]  ;;  %v232_v21 = vld [vmem:[%s540_s5 + $0x10] sm:$0xff] }
  0x16   :  { %387 = vmatpush3.bf16.msra.mxu0 %v384_v3  ;;  %v396_v13 = vpack.c.bf16 %v231_v12, %v230_v11  ;;  %v330_v14 = vld [vmem:[%s537_s2] ss:$0 sm:$0xff]  ;;  %v233_v22 = vld [vmem:[%s540_s5 + $0x18] sm:$0xff] }
  0x17   :  { %389 = vmatprep.subr.bf16.mxu1 %v388_v6  ;;  %v400_v23 = vpack.c.bf16 %v233_v22, %v232_v21  ;;  %v333_v24 = vld [vmem:[%s539_s4] ss:$0 sm:$0xff] }
  0x18   :  { %391 = vmatpush3.bf16.msra.mxu1 %v388_v6  ;;  %397 = vmatprep.subr.bf16.mxu0 %v396_v13  ;;  %v336_v31 = vld [vmem:[%s541_s6] ss:$0 sm:$0xff] }
  0x19   :  { %360 = vmatmul.mubr.msk.f32.vlgmr.msra.gmra.mrb[0].mxu0 %vm51_vm0, %v41_v7  ;;  %393 = vmatprep.subr.bf16.mxu1 %v392_v10 }
  0x1a   :  { %399 = vmatpush3.bf16.msra.mxu0 %v396_v13 }
  0x1b   :  { %401 = vmatprep.subr.bf16.mxu0 %v400_v23 }
  0x1c   :  { %395 = vmatpush3.bf16.msra.mxu1 %v392_v10 }
  0x1e   :  { %403 = vmatpush3.bf16.msra.mxu0 %v400_v23 }
  0xec   :  { %v361_v15 = vpop.f32.mrb[0].mxu0 }
  0xed   :  { %v130_v16 = vadd.f32 %v361_v15, %v330_v14  ;;  %v124_v17 = vpop.f32.mrb[1].mxu0 }
  0xee   :  { %v125_v18 = vadd.f32 %v330_v14, %v124_v17 }
  0xef   :  { %v134_v20 = vmax.f32 %v130_v16, 0.0 }
  0xf0   :  { %v133_v19 = vmax.f32 %v125_v18, 0.0 }
  0xf2   :  { %370 = vmatprep.mubr.msk.f32.mxu1 %vm146_vm1, %v133_v19 }
  0xf3   :  { %371 = vmatmul.mubr.msk.f32.vlgmr.msra.gmra.mrb[0].mxu1 %vm146_vm1, %v134_v20 }
 0x1c6   :  { %v372_v25 = vpop.f32.mrb[0].mxu1 }
 0x1c7   :  { %v225_v26 = vadd.f32 %v372_v25, %v333_v24  ;;  %v219_v27 = vpop.f32.mrb[1].mxu1 }
 0x1c8   :  { %v220_v28 = vadd.f32 %v333_v24, %v219_v27 }
 0x1c9   :  { %v229_v30 = vmax.f32 %v225_v26, 0.0 }
 0x1ca   :  { %v228_v29 = vmax.f32 %v220_v28, 0.0 }
 0x1cc   :  { %381 = vmatprep.mubr.msk.f32.mxu0 %vm146_vm1, %v228_v29 }
 0x1cd   :  { %382 = vmatmul.mubr.msk.f32.vlgmr.msra.gmra.mrb[2].mxu0 %vm146_vm1, %v229_v30 }
 0x2a0   :  { %v383_v32 = vpop.f32.mrb[2].mxu0 }
 0x2a1   :  { %v319_v33 = vadd.f32 %v383_v32, %v336_v31  ;;  %v313_v34 = vpop.f32.mrb[3].mxu0 }
 0x2a2   :  { %v314_v35 = vadd.f32 %v336_v31, %v313_v34 }
 0x2a3   :  { %324 = vst.msk [vmem:[%s542_s7 + $0x8] sm:$0xff] %vm322_vm2, %v319_v33 }
 0x2a4   :  { %323 = vst.msk [vmem:[%s542_s7] sm:$0xff] %vm322_vm2, %v314_v35 }
 0x2a5   :  { %329 = vsyncpa [#allocation3], 1 }

</bundles_post_ra>
